<compile_context>
chip_gen: v7x
topology: tpu7x:2x2x1
jax: 0.10.0
libtpu: 0.0.40
codegen_flags: <defaults>
</compile_context>

<pallas_src>
import functools

import jax
import jax.numpy as jnp
import numpy as np
from jax import lax
from jax.experimental import pallas as pl
from jax.experimental.pallas import tpu as pltpu


def _dwconv_kernel(x_ref, w_ref, b_ref, o_ref, xp_ref, *, strip):
    # x_ref : (nb, H, W, Cb)          NHWC input block (any float dtype)
    # w_ref : (9, Cb)  f32            depthwise taps, w_ref[ky*3+kx, c]
    # b_ref : (1, Cb)  f32            bias
    # o_ref : (nb, H, W, Cb)          NHWC output block (same dtype as input)
    # xp_ref: (nb, H+2, W+2, Cb) f32  zero-padded copy of the input block
    nb, H, W, C = x_ref.shape

    # ---- padded tile: zero only the 1-px halo, overwrite the interior -------
    xp_ref[:, 0:1, :, :] = jnp.zeros((nb, 1, W + 2, C), jnp.float32)
    xp_ref[:, H + 1:H + 2, :, :] = jnp.zeros((nb, 1, W + 2, C), jnp.float32)
    xp_ref[:, :, 0:1, :] = jnp.zeros((nb, H + 2, 1, C), jnp.float32)
    xp_ref[:, :, W + 1:W + 2, :] = jnp.zeros((nb, H + 2, 1, C), jnp.float32)
    xp_ref[:, 1:H + 1, 1:W + 1, :] = x_ref[...].astype(jnp.float32)

    # Hoist the (C,) -> (1,1,1,C) broadcasts out of the loops
    # (broadcast_in_dim is not CSE'd by JAX).
    taps_w = [w_ref[k, :].reshape(1, 1, 1, C) for k in range(9)]
    bias = b_ref[0, :].reshape(1, 1, 1, C)

    n_strips = H // strip

    # ---- depthwise 3x3 as 9 VPU multiply-adds, row strips via fori_loop -----
    def strip_body(i, carry):
        h0 = pl.multiple_of(i * strip, strip)
        # Bias folded into the accumulator init: acc = tap0 * w0 + bias.
        acc = xp_ref[:, pl.ds(h0, strip), 0:W, :] * taps_w[0] + bias
        for k in range(1, 9):            # 9-tap loop stays unrolled (fixed, short)
            ky, kx = divmod(k, 3)
            tap = xp_ref[:, pl.ds(h0 + ky, strip), kx:kx + W, :]
            acc = acc + tap * taps_w[k]
        o_ref[:, pl.ds(h0, strip), :, :] = acc.astype(o_ref.dtype)
        return carry

    lax.fori_loop(0, n_strips, strip_body, 0)


def _choose_blocks(N, C, H, W, x_itemsize,
                   vmem_budget=32 * 1024 * 1024,
                   acc_budget_elems=16 * 1024):
    """Pick (batch_block, channel_block) for the grid.

    Channels go on the lanes in 128-wide blocks (when divisible) so the grid
    has channel parallelism for v7x megacore; the batch block is the largest
    divisor of N that (a) leaves >= 2 batch grid steps, (b) keeps the pipeline
    working set (2x in + 2x out + f32 padded scratch) under the VMEM budget and
    (c) keeps the per-strip accumulator inside the register file.
    """
    cb = 128 if (C % 128 == 0 and C > 128) else C

    def vmem_bytes(nb):
        blk = nb * H * W * cb
        pad = nb * (H + 2) * (W + 2) * cb
        return 4 * blk * x_itemsize + pad * 4 + 4 * 10 * cb * 4

    nb = 1
    cap = max(1, N // 2)                 # >= 2 batch grid steps whenever N >= 2
    for d in range(1, cap + 1):
        if N % d != 0:
            continue
        if vmem_bytes(d) > vmem_budget:
            continue
        if d > 1 and d * W * cb > acc_budget_elems:
            continue                     # keep strip >= 1 within the vreg budget
        nb = d
    return nb, cb


def _pick_strip(nb, H, W, cb, acc_budget_elems=16 * 1024):
    """Largest divisor of H whose f32 accumulator fits in ~16 vregs."""
    for cand in range(H, 0, -1):
        if H % cand == 0 and nb * cand * W * cb <= acc_budget_elems:
            return cand
    return 1


def dwconv_forward_nhwc(x_nhwc, weight, bias):
    """DWConv.forward on an NHWC tensor: (N, H, W, C) -> (N, H, W, C).

    weight: (C, 1, 3, 3) PyTorch depthwise layout; bias: (C,).
    Output dtype == input dtype (feed bf16 activations on HBM-bound v5e/v6e;
    accumulation is f32 inside the kernel).
    """
    N, H, W, C = x_nhwc.shape
    assert weight.shape == (C, 1, 3, 3), weight.shape
    assert bias.shape == (C,), bias.shape

    w = jnp.transpose(weight.reshape(C, 9), (1, 0)).astype(jnp.float32)   # (9, C)
    b = bias.reshape(1, C).astype(jnp.float32)                            # (1, C)

    nb, cb = _choose_blocks(N, C, H, W, x_nhwc.dtype.itemsize)
    strip = _pick_strip(nb, H, W, cb)
    grid = (N // nb, C // cb)

    return pl.pallas_call(
        functools.partial(_dwconv_kernel, strip=strip),
        out_shape=jax.ShapeDtypeStruct((N, H, W, C), x_nhwc.dtype),
        grid_spec=pltpu.PrefetchScalarGridSpec(
            num_scalar_prefetch=0,
            grid=grid,
            in_specs=[
                pl.BlockSpec((nb, H, W, cb), lambda n, c: (n, 0, 0, c)),
                pl.BlockSpec((9, cb), lambda n, c: (0, c)),
                pl.BlockSpec((1, cb), lambda n, c: (0, c)),
            ],
            out_specs=pl.BlockSpec((nb, H, W, cb), lambda n, c: (n, 0, 0, c)),
            scratch_shapes=[
                pltpu.VMEM((nb, H + 2, W + 2, cb), jnp.float32),   # padded tile
            ],
        ),
        compiler_params=pltpu.CompilerParams(
            dimension_semantics=("parallel", "parallel"),   # independent blocks
            vmem_limit_bytes=48 * 1024 * 1024,
        ),
    )(x_nhwc, w, b)


def dwconv_forward(x_nchw, weight, bias):
    """Module-compatible entry point: x (N, C, H, W) -> (N, C, H, W).

    NOTE: the two transposes are full HBM passes; keep the surrounding model
    NHWC end-to-end and call dwconv_forward_nhwc directly where possible.
    """
    x = jnp.transpose(x_nchw, (0, 2, 3, 1))
    y = dwconv_forward_nhwc(x, weight, bias)
    return jnp.transpose(y, (0, 3, 1, 2))


def dwconv_reference(x_nchw, weight, bias):
    """Pure-JAX reference (same semantics) for validation."""
    N, C, H, W = x_nchw.shape
    x = jnp.transpose(x_nchw, (0, 2, 3, 1)).astype(jnp.float32)           # NHWC
    w_hwio = jnp.transpose(weight, (2, 3, 1, 0)).astype(jnp.float32)      # (3,3,1,C)
    dn = lax.conv_dimension_numbers(x.shape, w_hwio.shape, ("NHWC", "HWIO", "NHWC"))
    y = lax.conv_general_dilated(x, w_hwio, (1, 1), "SAME",
                                 dimension_numbers=dn, feature_group_count=C)
    y = y + bias.reshape(1, 1, 1, C)
    return jnp.transpose(y, (0, 3, 1, 2))


if __name__ == "__main__":
    key = jax.random.PRNGKey(0)
    kx, kw, kb = jax.random.split(key, 3)

    # Small DWConv(dim=128): channels on the lanes are fully dense (128-wide).
    N, C, H, W = 2, 128, 16, 16

    x = jax.random.normal(kx, (N, C, H, W), jnp.float32)
    weight = 0.3 * jax.random.normal(kw, (C, 1, 3, 3), jnp.float32)
    bias = 0.1 * jax.random.normal(kb, (C,), jnp.float32)

    ref = jax.block_until_ready(dwconv_reference(x, weight, bias))

    # f32 I/O path (module default).
    out = jax.block_until_ready(dwconv_forward(x, weight, bias))
    assert out.shape == (N, C, H, W), out.shape
    np.testing.assert_allclose(np.asarray(out), np.asarray(ref),
                               rtol=1e-4, atol=1e-4)

    # bf16 I/O path (recommended on HBM-bound v5e/v6e): f32 accumulate inside.
    out_bf16 = jax.block_until_ready(
        dwconv_forward(x.astype(jnp.bfloat16), weight, bias))
    np.testing.assert_allclose(np.asarray(out_bf16.astype(jnp.float32)),
                               np.asarray(ref), rtol=1e-1, atol=1e-1)

    print("KERNEL_OK")
</pallas_src>

<mosaic_0001>
module attributes {stable_mosaic.version = 11 : i64} {
  func.func @_dwconv_kernel(%arg0: i32, %arg1: i32, %arg2: memref<1x16x16x128xf32, #tpu.memory_space<vmem>>, %arg3: memref<9x128xf32, #tpu.memory_space<vmem>>, %arg4: memref<1x128xf32, #tpu.memory_space<vmem>>, %arg5: memref<1x16x16x128xf32, #tpu.memory_space<vmem>>, %arg6: memref<1x18x18x128xf32, #tpu.memory_space<vmem>>) attributes {dimension_semantics = [#tpu.dimension_semantics<parallel>, #tpu.dimension_semantics<parallel>], iteration_bounds = array<i64: 2, 1>, scalar_prefetch = 0 : i64, scratch_operands = 1 : i64, tpu.core_type = #tpu.core_type<tc>, window_params = [{transform_indices = @transform_0, window_bounds = array<i64: 1, 16, 16, 128>}, {transform_indices = @transform_1, window_bounds = array<i64: 9, 128>}, {transform_indices = @transform_2, window_bounds = array<i64: 1, 128>}, {transform_indices = @transform_3, window_bounds = array<i64: 1, 16, 16, 128>}]} {
    %cst = arith.constant 0.000000e+00 : f32
    %0 = vector.broadcast %cst : f32 to vector<1x1x18x128xf32>
    %c0 = arith.constant 0 : index
    %c0_0 = arith.constant 0 : index
    %c0_1 = arith.constant 0 : index
    %c0_2 = arith.constant 0 : index
    %1 = vector.load %arg6[%c0, %c0_0, %c0_1, %c0_2] : memref<1x18x18x128xf32, #tpu.memory_space<vmem>>, vector<1x1x18x128xf32>
    tpu.vector_store %arg6[%c0, %c0_0, %c0_1, %c0_2], %0 {strides = array<i32>} : memref<1x18x18x128xf32, #tpu.memory_space<vmem>>, vector<1x1x18x128xf32>,
    %cst_3 = arith.constant 0.000000e+00 : f32
    %2 = vector.broadcast %cst_3 : f32 to vector<1x1x18x128xf32>
    %c0_4 = arith.constant 0 : index
    %c17 = arith.constant 17 : index
    %c0_5 = arith.constant 0 : index
    %c0_6 = arith.constant 0 : index
    %3 = vector.load %arg6[%c0_4, %c17, %c0_5, %c0_6] : memref<1x18x18x128xf32, #tpu.memory_space<vmem>>, vector<1x1x18x128xf32>
    tpu.vector_store %arg6[%c0_4, %c17, %c0_5, %c0_6], %2 {strides = array<i32>} : memref<1x18x18x128xf32, #tpu.memory_space<vmem>>, vector<1x1x18x128xf32>,
    %cst_7 = arith.constant 0.000000e+00 : f32
    %4 = vector.broadcast %cst_7 : f32 to vector<1x18x1x128xf32>
    %c0_8 = arith.constant 0 : index
    %c0_9 = arith.constant 0 : index
    %c0_10 = arith.constant 0 : index
    %c0_11 = arith.constant 0 : index
    %5 = vector.load %arg6[%c0_8, %c0_9, %c0_10, %c0_11] : memref<1x18x18x128xf32, #tpu.memory_space<vmem>>, vector<1x18x1x128xf32>
    tpu.vector_store %arg6[%c0_8, %c0_9, %c0_10, %c0_11], %4 {strides = array<i32>} : memref<1x18x18x128xf32, #tpu.memory_space<vmem>>, vector<1x18x1x128xf32>,
    %cst_12 = arith.constant 0.000000e+00 : f32
    %6 = vector.broadcast %cst_12 : f32 to vector<1x18x1x128xf32>
    %c0_13 = arith.constant 0 : index
    %c0_14 = arith.constant 0 : index
    %c17_15 = arith.constant 17 : index
    %c0_16 = arith.constant 0 : index
    %7 = vector.load %arg6[%c0_13, %c0_14, %c17_15, %c0_16] : memref<1x18x18x128xf32, #tpu.memory_space<vmem>>, vector<1x18x1x128xf32>
    tpu.vector_store %arg6[%c0_13, %c0_14, %c17_15, %c0_16], %6 {strides = array<i32>} : memref<1x18x18x128xf32, #tpu.memory_space<vmem>>, vector<1x18x1x128xf32>,
    %c0_17 = arith.constant 0 : index
    %c0_18 = arith.constant 0 : index
    %c0_19 = arith.constant 0 : index
    %c0_20 = arith.constant 0 : index
    %8 = vector.load %arg2[%c0_17, %c0_18, %c0_19, %c0_20] : memref<1x16x16x128xf32, #tpu.memory_space<vmem>>, vector<1x16x16x128xf32>
    %c0_21 = arith.constant 0 : index
    %c1 = arith.constant 1 : index
    %c1_22 = arith.constant 1 : index
    %c0_23 = arith.constant 0 : index
    %9 = vector.load %arg6[%c0_21, %c1, %c1_22, %c0_23] : memref<1x18x18x128xf32, #tpu.memory_space<vmem>>, vector<1x16x16x128xf32>
    tpu.vector_store %arg6[%c0_21, %c1, %c1_22, %c0_23], %8 {strides = array<i32>} : memref<1x18x18x128xf32, #tpu.memory_space<vmem>>, vector<1x16x16x128xf32>,
    %c0_24 = arith.constant 0 : index
    %c0_25 = arith.constant 0 : index
    %10 = vector.load %arg3[%c0_24, %c0_25] : memref<9x128xf32, #tpu.memory_space<vmem>>, vector<1x128xf32>
    %11 = vector.shape_cast %10 : vector<1x128xf32> to vector<128xf32>
    %12 = vector.shape_cast %11 : vector<128xf32> to vector<1x1x1x128xf32>
    %c1_26 = arith.constant 1 : index
    %c0_27 = arith.constant 0 : index
    %13 = vector.load %arg3[%c1_26, %c0_27] : memref<9x128xf32, #tpu.memory_space<vmem>>, vector<1x128xf32>
    %14 = vector.shape_cast %13 : vector<1x128xf32> to vector<128xf32>
    %15 = vector.shape_cast %14 : vector<128xf32> to vector<1x1x1x128xf32>
    %c2 = arith.constant 2 : index
    %c0_28 = arith.constant 0 : index
    %16 = vector.load %arg3[%c2, %c0_28] : memref<9x128xf32, #tpu.memory_space<vmem>>, vector<1x128xf32>
    %17 = vector.shape_cast %16 : vector<1x128xf32> to vector<128xf32>
    %18 = vector.shape_cast %17 : vector<128xf32> to vector<1x1x1x128xf32>
    %c3 = arith.constant 3 : index
    %c0_29 = arith.constant 0 : index
    %19 = vector.load %arg3[%c3, %c0_29] : memref<9x128xf32, #tpu.memory_space<vmem>>, vector<1x128xf32>
    %20 = vector.shape_cast %19 : vector<1x128xf32> to vector<128xf32>
    %21 = vector.shape_cast %20 : vector<128xf32> to vector<1x1x1x128xf32>
    %c4 = arith.constant 4 : index
    %c0_30 = arith.constant 0 : index
    %22 = vector.load %arg3[%c4, %c0_30] : memref<9x128xf32, #tpu.memory_space<vmem>>, vector<1x128xf32>
    %23 = vector.shape_cast %22 : vector<1x128xf32> to vector<128xf32>
    %24 = vector.shape_cast %23 : vector<128xf32> to vector<1x1x1x128xf32>
    %c5 = arith.constant 5 : index
    %c0_31 = arith.constant 0 : index
    %25 = vector.load %arg3[%c5, %c0_31] : memref<9x128xf32, #tpu.memory_space<vmem>>, vector<1x128xf32>
    %26 = vector.shape_cast %25 : vector<1x128xf32> to vector<128xf32>
    %27 = vector.shape_cast %26 : vector<128xf32> to vector<1x1x1x128xf32>
    %c6 = arith.constant 6 : index
    %c0_32 = arith.constant 0 : index
    %28 = vector.load %arg3[%c6, %c0_32] : memref<9x128xf32, #tpu.memory_space<vmem>>, vector<1x128xf32>
    %29 = vector.shape_cast %28 : vector<1x128xf32> to vector<128xf32>
    %30 = vector.shape_cast %29 : vector<128xf32> to vector<1x1x1x128xf32>
    %c7 = arith.constant 7 : index
    %c0_33 = arith.constant 0 : index
    %31 = vector.load %arg3[%c7, %c0_33] : memref<9x128xf32, #tpu.memory_space<vmem>>, vector<1x128xf32>
    %32 = vector.shape_cast %31 : vector<1x128xf32> to vector<128xf32>
    %33 = vector.shape_cast %32 : vector<128xf32> to vector<1x1x1x128xf32>
    %c8 = arith.constant 8 : index
    %c0_34 = arith.constant 0 : index
    %34 = vector.load %arg3[%c8, %c0_34] : memref<9x128xf32, #tpu.memory_space<vmem>>, vector<1x128xf32>
    %35 = vector.shape_cast %34 : vector<1x128xf32> to vector<128xf32>
    %36 = vector.shape_cast %35 : vector<128xf32> to vector<1x1x1x128xf32>
    %c0_35 = arith.constant 0 : index
    %c0_36 = arith.constant 0 : index
    %37 = vector.load %arg4[%c0_35, %c0_36] : memref<1x128xf32, #tpu.memory_space<vmem>>, vector<1x128xf32>
    %38 = vector.shape_cast %37 : vector<1x128xf32> to vector<128xf32>
    %39 = vector.shape_cast %38 : vector<128xf32> to vector<1x1x1x128xf32>
    %c0_i32 = arith.constant 0 : i32
    %c2_i32 = arith.constant 2 : i32
    %40 = arith.addi %c0_i32, %c2_i32 : i32
    %c1_i32 = arith.constant 1 : i32
    scf.for %arg7 = %c0_i32 to %40 step %c1_i32  : i32 {
      %c8_i32 = arith.constant 8 : i32
      %41 = arith.muli %arg7, %c8_i32 : i32
      %42 = tpu.assume_multiple %41, 8 : i32
      %c0_38 = arith.constant 0 : index
      %43 = arith.index_cast %42 : i32 to index
      %c0_39 = arith.constant 0 : index
      %c0_40 = arith.constant 0 : index
      %44 = vector.load %arg6[%c0_38, %43, %c0_39, %c0_40] : memref<1x18x18x128xf32, #tpu.memory_space<vmem>>, vector<1x8x16x128xf32>
      %45 = vector.broadcast %12 : vector<1x1x1x128xf32> to vector<1x8x16x128xf32>
      %46 = arith.mulf %44, %45 : vector<1x8x16x128xf32>
      %47 = vector.broadcast %39 : vector<1x1x1x128xf32> to vector<1x8x16x128xf32>
      %48 = arith.addf %46, %47 : vector<1x8x16x128xf32>
      %c0_i32_41 = arith.constant 0 : i32
      %49 = arith.addi %42, %c0_i32_41 : i32
      %c0_42 = arith.constant 0 : index
      %50 = arith.index_cast %49 : i32 to index
      %c1_43 = arith.constant 1 : index
      %c0_44 = arith.constant 0 : index
      %51 = vector.load %arg6[%c0_42, %50, %c1_43, %c0_44] : memref<1x18x18x128xf32, #tpu.memory_space<vmem>>, vector<1x8x16x128xf32>
      %52 = vector.broadcast %15 : vector<1x1x1x128xf32> to vector<1x8x16x128xf32>
      %53 = arith.mulf %51, %52 : vector<1x8x16x128xf32>
      %54 = arith.addf %48, %53 : vector<1x8x16x128xf32>
      %c0_i32_45 = arith.constant 0 : i32
      %55 = arith.addi %42, %c0_i32_45 : i32
      %c0_46 = arith.constant 0 : index
      %56 = arith.index_cast %55 : i32 to index
      %c2_47 = arith.constant 2 : index
      %c0_48 = arith.constant 0 : index
      %57 = vector.load %arg6[%c0_46, %56, %c2_47, %c0_48] : memref<1x18x18x128xf32, #tpu.memory_space<vmem>>, vector<1x8x16x128xf32>
      %58 = vector.broadcast %18 : vector<1x1x1x128xf32> to vector<1x8x16x128xf32>
      %59 = arith.mulf %57, %58 : vector<1x8x16x128xf32>
      %60 = arith.addf %54, %59 : vector<1x8x16x128xf32>
      %c1_i32_49 = arith.constant 1 : i32
      %61 = arith.addi %42, %c1_i32_49 : i32
      %c0_50 = arith.constant 0 : index
      %62 = arith.index_cast %61 : i32 to index
      %c0_51 = arith.constant 0 : index
      %c0_52 = arith.constant 0 : index
      %63 = vector.load %arg6[%c0_50, %62, %c0_51, %c0_52] : memref<1x18x18x128xf32, #tpu.memory_space<vmem>>, vector<1x8x16x128xf32>
      %64 = vector.broadcast %21 : vector<1x1x1x128xf32> to vector<1x8x16x128xf32>
      %65 = arith.mulf %63, %64 : vector<1x8x16x128xf32>
      %66 = arith.addf %60, %65 : vector<1x8x16x128xf32>
      %c1_i32_53 = arith.constant 1 : i32
      %67 = arith.addi %42, %c1_i32_53 : i32
      %c0_54 = arith.constant 0 : index
      %68 = arith.index_cast %67 : i32 to index
      %c1_55 = arith.constant 1 : index
      %c0_56 = arith.constant 0 : index
      %69 = vector.load %arg6[%c0_54, %68, %c1_55, %c0_56] : memref<1x18x18x128xf32, #tpu.memory_space<vmem>>, vector<1x8x16x128xf32>
      %70 = vector.broadcast %24 : vector<1x1x1x128xf32> to vector<1x8x16x128xf32>
      %71 = arith.mulf %69, %70 : vector<1x8x16x128xf32>
      %72 = arith.addf %66, %71 : vector<1x8x16x128xf32>
      %c1_i32_57 = arith.constant 1 : i32
      %73 = arith.addi %42, %c1_i32_57 : i32
      %c0_58 = arith.constant 0 : index
      %74 = arith.index_cast %73 : i32 to index
      %c2_59 = arith.constant 2 : index
      %c0_60 = arith.constant 0 : index
      %75 = vector.load %arg6[%c0_58, %74, %c2_59, %c0_60] : memref<1x18x18x128xf32, #tpu.memory_space<vmem>>, vector<1x8x16x128xf32>
      %76 = vector.broadcast %27 : vector<1x1x1x128xf32> to vector<1x8x16x128xf32>
      %77 = arith.mulf %75, %76 : vector<1x8x16x128xf32>
      %78 = arith.addf %72, %77 : vector<1x8x16x128xf32>
      %c2_i32_61 = arith.constant 2 : i32
      %79 = arith.addi %42, %c2_i32_61 : i32
      %c0_62 = arith.constant 0 : index
      %80 = arith.index_cast %79 : i32 to index
      %c0_63 = arith.constant 0 : index
      %c0_64 = arith.constant 0 : index
      %81 = vector.load %arg6[%c0_62, %80, %c0_63, %c0_64] : memref<1x18x18x128xf32, #tpu.memory_space<vmem>>, vector<1x8x16x128xf32>
      %82 = vector.broadcast %30 : vector<1x1x1x128xf32> to vector<1x8x16x128xf32>
      %83 = arith.mulf %81, %82 : vector<1x8x16x128xf32>
      %84 = arith.addf %78, %83 : vector<1x8x16x128xf32>
      %c2_i32_65 = arith.constant 2 : i32
      %85 = arith.addi %42, %c2_i32_65 : i32
      %c0_66 = arith.constant 0 : index
      %86 = arith.index_cast %85 : i32 to index
      %c1_67 = arith.constant 1 : index
      %c0_68 = arith.constant 0 : index
      %87 = vector.load %arg6[%c0_66, %86, %c1_67, %c0_68] : memref<1x18x18x128xf32, #tpu.memory_space<vmem>>, vector<1x8x16x128xf32>
      %88 = vector.broadcast %33 : vector<1x1x1x128xf32> to vector<1x8x16x128xf32>
      %89 = arith.mulf %87, %88 : vector<1x8x16x128xf32>
      %90 = arith.addf %84, %89 : vector<1x8x16x128xf32>
      %c2_i32_69 = arith.constant 2 : i32
      %91 = arith.addi %42, %c2_i32_69 : i32
      %c0_70 = arith.constant 0 : index
      %92 = arith.index_cast %91 : i32 to index
      %c2_71 = arith.constant 2 : index
      %c0_72 = arith.constant 0 : index
      %93 = vector.load %arg6[%c0_70, %92, %c2_71, %c0_72] : memref<1x18x18x128xf32, #tpu.memory_space<vmem>>, vector<1x8x16x128xf32>
      %94 = vector.broadcast %36 : vector<1x1x1x128xf32> to vector<1x8x16x128xf32>
      %95 = arith.mulf %93, %94 : vector<1x8x16x128xf32>
      %96 = arith.addf %90, %95 : vector<1x8x16x128xf32>
      %c0_73 = arith.constant 0 : index
      %97 = arith.index_cast %42 : i32 to index
      %c0_74 = arith.constant 0 : index
      %c0_75 = arith.constant 0 : index
      %98 = vector.load %arg5[%c0_73, %97, %c0_74, %c0_75] : memref<1x16x16x128xf32, #tpu.memory_space<vmem>>, vector<1x8x16x128xf32>
      tpu.vector_store %arg5[%c0_73, %97, %c0_74, %c0_75], %96 {strides = array<i32>} : memref<1x16x16x128xf32, #tpu.memory_space<vmem>>, vector<1x8x16x128xf32>,
    }
    %c2_i32_37 = arith.constant 2 : i32
    return
  }
  func.func @transform_0(%arg0: i32, %arg1: i32) -> (i32, i32, i32, i32) {
    %c0_i32 = arith.constant 0 : i32
    %c0_i32_0 = arith.constant 0 : i32
    %c0_i32_1 = arith.constant 0 : i32
    return %arg0, %c0_i32, %c0_i32_0, %arg1 : i32, i32, i32, i32
  }
  func.func @transform_1(%arg0: i32, %arg1: i32) -> (i32, i32) {
    %c0_i32 = arith.constant 0 : i32
    %c0_i32_0 = arith.constant 0 : i32
    return %c0_i32, %arg1 : i32, i32
  }
  func.func @transform_2(%arg0: i32, %arg1: i32) -> (i32, i32) {
    %c0_i32 = arith.constant 0 : i32
    %c0_i32_0 = arith.constant 0 : i32
    return %c0_i32, %arg1 : i32, i32
  }
  func.func @transform_3(%arg0: i32, %arg1: i32) -> (i32, i32, i32, i32) {
    %c0_i32 = arith.constant 0 : i32
    %c0_i32_0 = arith.constant 0 : i32
    %c0_i32_1 = arith.constant 0 : i32
    return %arg0, %c0_i32, %c0_i32_0, %arg1 : i32, i32, i32, i32
  }
}

</mosaic_0001>

<bundles_post_ra>
// kernel: tpu_custom_call.1
= control target key start
LH: loop header
LB: loop body
LE: loop exit
PB: predicated region body
PF: predicated region fallthrough
CT: control target
= control target key end

     0   :  { %8 = vsyncpa [#allocation4], 0  ;;  %s1973_s0 = inlined_call_operand.hbm [shape: f32[2,16,16,128], index: 0, kind: input, shape index: {}]   ;;  %s1974_s1 = inlined_call_operand.hbm [shape: f32[9,128], index: 1, kind: input, shape index: {}]   ;;  %s1975_s2 = inlined_call_operand.vmem [shape: f32[1,128], index: 2, kind: input, shape index: {}]   ;;  %s1976_s3 = inlined_call_operand.hbm [shape: f32[2,16,16,128], index: 3, kind: output, shape index: {}]  }
   0x1   :  { %10 = vsyncpa [#allocation4 + $0x1], 0 }
   0x2   :  { %11 = vsyncpa [#allocation7], 0 }
   0x3   :  { %12 = vsyncpa [#allocation5], 0 }
   0x4   :  { %14 = vsyncpa [#allocation5 + $0x1], 0  ;;  %s1410_s12 = smov 0   ;;  %s1412_s13 = smov 0  }
   0x5   :  { %s1414_s14 = smov 0   ;;  %s1416_s15 = smov 0  }
   0x6   :  { %s1418_s16 = smov 0   ;;  %s1420_s17 = smov 0  }
   0x7 LB: > { %s1008_s18 = sadd.s32 4294967295, %s1376_s17   ;;  %s1009_s19 = sadd.s32 4294967294, %s1376_s17   ;;  %s1376_s17 = sphi %s1420_s17, %s20_s17   ;;  %s1372_s16 = sphi %s1418_s16, %s2000_s16   ;;  %s1368_s15 = sphi %s1416_s15, %s1999_s15   ;;  %s1364_s14 = sphi %s1414_s14, %s1998_s14   ;;  %s1360_s13 = sphi %s1412_s13, %s1997_s13   ;;  %s1356_s12 = sphi %s1410_s12, %s1996_s12  }
   0x8   : > { %p54_p0 = scmp.ne.s32.totalorder %s1360_s13, %s1356_s12  ;;  %p1444_p1 = scmp.eq.s32.totalorder %s1008_s18, 0 }
   0x9   : > { %p1448_p2 = scmp.eq.s32.totalorder %s1008_s18, 1  ;;  %p138_p3 = scmp.eq.s32.totalorder %s1009_s19, 1 }
   0xa   : > { %s1981_s20 = scalar_select %p1444_p1, 1, 0 }
   0xb   : > { %s1982_s21 = scalar_select %p1448_p2, 1, 0 }
   0xc   : > { %p1454_p4 = por %p1444_p1, %p54_p0  ;;  %p1010_p5 = scmp.ge.s32.totalorder %s1376_s17, 1 }
   0xd   : > { %p1459_p6 = por %p138_p3, %p54_p0  ;;  %p145_p7 = scmp.lt.s32.totalorder %s1376_s17, 3 }
   0xe   : > { %s1983_s22 = scalar_select %p1454_p4, 1, 0 }
   0xf   : > { %s1984_s23 = scalar_select %p1459_p6, 1, 0 }
  0x10   : > { %p1464_p8 = pnand %p1010_p5, %p145_p7  ;;  %s1382_s25 = smov [#allocation6]  }
  0x11   : > { %s159_s26 = sshll.u32 %s1382_s25, 4  ;;  %s32_s28 = sadd.s32 1, %s1372_s16  ;;  %s160_s26 = int_to_ptr.vmem [resolvable:$true] %s159_s26 }
  0x12   : > { %s1985_s24 = scalar_select %p1464_p8, 1, 0 }
  0x13   : > { %p1150_p9 = pneg %p1464_p8  ;;  %s1228_s4 = scalar_lea.hbm %s1974_s1, 256 }
  0x14   : > { %p1229_p12 = scmp.ne.s32.totalorder %s1974_s1, %s1228_s4  ;;  %p1235_p5 = scmp.lt.u32.totalorder %s1228_s4, %s1974_s1 }
  0x15   : > { %p1473_p11 = pnand %p1150_p9, %p1444_p1 }
  0x17   : > { %p1230_p13 = pneg %p1473_p11 }
  0x19   : > { %p1231_p0 = pnand %p1230_p13, %p1229_p12 }
  0x1b   : > { %p1232_p3 = pneg %p1231_p0 }
  0x1d   : > { %p1237_p7 = pnand %p1235_p5, %p1232_p3 }
  0x1f   : > { %1240 = shalt.err (!%p1237_p7)
}
  0x20   : > { %s1241_s9 = scalar_lea.vmem %s160_s26, 256  ;;  %p1249_p1 = scmp.lt.s32.totalorder %s160_s26, %s160_s26 }
  0x21   : > { %p1242_p9 = scmp.ne.s32.totalorder %s160_s26, %s1241_s9  ;;  %p1250_p4 = scmp.lt.s32.totalorder %s1241_s9, %s1241_s9 }
  0x23   : > { %p1244_p10 = pnand %p1242_p9, %p1230_p13  ;;  %p1251_p8 = por %p1250_p4, %p1249_p1 }
  0x25   : > { %p1245_p6 = pneg %p1244_p10 }
  0x27   : > { %p1252_p2 = pnand %p1251_p8, %p1245_p6 }
  0x29   : > { %1255 = shalt.err (!%p1252_p2)
}
  0x2a   : > { %s1383_s10 = smov 128   ;;  %s1384_s11 = smov 8  }
  0x2b   : > { %1153 = dma.hbm_to_vmem [thread:$0]  (!%p1473_p11), %s1974_s1, 256, %s160_s26, [#allocation7], %s1383_s10, %s1383_s10, %s1384_s11  }
  0x2c   : > { %p34_p1 = scmp.ge.s32.totalorder %s32_s28, 2  ;;  %s41_s25 = sadd.s32 1, %s1364_s14 }
  0x2d   : > { %p48_p2 = scmp.ne.s32.totalorder %s1364_s14, %s1360_s13  ;;  %p49_p4 = scmp.eq.s32.totalorder %s1376_s17, 0 }
  0x2e   : > { %s2002_s28 = smov (%p34_p1, %s32_s28), 0  ;;  %p1988_p8 = scmp.ne.s32.totalorder %s1982_s21, 0 }
  0x2f   : > { %p1503_p6 = por %p49_p4, %p48_p2  ;;  %s36_s30 = ssub.s32 %s1372_s16, %s2002_s28 }
  0x30   : > { %p1509_p10 = por %p1988_p8, %p48_p2  ;;  %p1163_p12 = scmp.lt.s32.totalorder %s1376_s17, 2 }
  0x31   : > { %p39_p11 = scmp.eq.s32.totalorder %s36_s30, 0  ;;  %s179_s26 = sand.u32 1, %s1364_s14  }
  0x32   : > { %s1014_s4 = sshll.u32 %s179_s26, 8  ;;  %s1139_s6 = sshll.u32 %s1372_s16, 12 }
  0x33   : > { %s1518_s5 = scalar_select %p39_p11, %s1364_s14, %s41_s25  }
  0x34   : > { %s1524_s9 = scalar_lea.hbm %s1973_s0, %s1139_s6  ;;  %s183_s21 = scalar_lea.vmem [#allocation3], %s1014_s4 }
  0x35   : > { %s191_s18 = sshll.u32 %s183_s21, 4  ;;  %p1530_p13 = pnand %p1163_p12, %p1503_p6  ;;  %s1526_s18 = int_to_ptr.vmem [resolvable:$true] %s191_s18 }
  0x36   : > { %s1534_s25 = scalar_lea.sflag [#allocation4], %s179_s26  ;;  %s1256_s30 = scalar_lea.hbm %s1524_s9, 4096 }
  0x37   : > { %p1257_p0 = scmp.ne.s32.totalorder %s1524_s9, %s1256_s30  ;;  %p1258_p3 = pneg %p1530_p13 }
  0x38   : > { %s1261_s29 = scalar_lea.hbm %s1973_s0, 8192  ;;  %p1262_p9 = scmp.lt.u32.totalorder %s1524_s9, %s1973_s0 }
  0x39   : > { %p1259_p5 = pnand %p1258_p3, %p1257_p0  ;;  %p1263_p1 = scmp.lt.u32.totalorder %s1261_s29, %s1256_s30 }
  0x3a   : > { %p1265_p4 = scmp.lt.u32.totalorder %s1256_s30, %s1524_s9 }
  0x3b   : > { %p1260_p7 = pneg %p1259_p5  ;;  %p1264_p2 = por %p1263_p1, %p1262_p9 }
  0x3d   : > { %p1266_p6 = por %p1265_p4, %p1264_p2 }
  0x3f   : > { %p1267_p8 = pnand %p1266_p6, %p1260_p7 }
  0x41   : > { %1270 = shalt.err (!%p1267_p8)
}
  0x42   : > { %s1271_s26 = scalar_lea.vmem %s1526_s18, 4096  ;;  %s1385_s21 = smov [#allocation3]  }
  0x43   : > { %p1272_p12 = scmp.ne.s32.totalorder %s1526_s18, %s1271_s26  ;;  %s1276_s4 = sshll.u32 %s1385_s21, 4  ;;  %s1277_s4 = int_to_ptr.vmem [resolvable:$false] %s1276_s4 }
  0x44   : > { %s1278_s6 = scalar_lea.vmem %s1277_s4, 8192  ;;  %p1279_p5 = scmp.lt.s32.totalorder %s1526_s18, %s1277_s4 }
  0x45   : > { %p1274_p11 = pnand %p1272_p12, %p1258_p3  ;;  %p1280_p9 = scmp.lt.s32.totalorder %s1278_s6, %s1271_s26 }
  0x47   : > { %p1275_p0 = pneg %p1274_p11  ;;  %p1281_p1 = por %p1280_p9, %p1279_p5 }
  0x49   : > { %p1282_p2 = pnand %p1281_p1, %p1275_p0 }
  0x4b   : > { %1285 = shalt.err (!%p1282_p2)
}
  0x4c   : > { %1157 = dma.hbm_to_vmem [thread:$0]  (!%p1530_p13), %s1524_s9, 4096, %s1526_s18, %s1534_s25, %s1383_s10, %s1383_s10, %s1384_s11  }
  0x4d   : > { %p1991_p3 = scmp.ne.s32.totalorder %s1985_s24, 0 }
  0x4e   : > { %s1568_s30 = sand.u32 (!%p1991_p3), 1, %s1360_s13   ;;  %p1992_p7 = scmp.ne.s32.totalorder (!%p1991_p3), %s1983_s22, 0 }
  0x4f   : > { %203 = sbr.rel (%p1991_p3) target bundleno = 232 (0xe8), region = 32  ;;  %s1018_s29 = sshll.u32 (!%p1991_p3), %s1568_s30, 8 }
  0x50   : > { %s206_s7 = scalar_lea.sflag (!%p1991_p3), [#allocation4], %s1568_s30  ;;  %s1574_s19 = scalar_lea.vmem (!%p1991_p3), [#allocation3], %s1018_s29 }
  0x56   : > { %1343 = dma.done.wait (%p1992_p7), %s206_s7, 4096  }
  0x57   : > { %1345 = vsyncadd (%p1992_p7), %s206_s7, 4294963200  ;;  %p1993_p13 = scmp.ne.s32.totalorder %s1981_s20, 0 }
  0x59   : > { %1347 = dma.done.wait (%p1993_p13), [#allocation7], 256  }
  0x5a   : > { %1349 = vsyncadd (%p1993_p13), [#allocation7], 4294967040  ;;  %v1386_v0 = vmov 0.0   ;;  %v1584_v1 = vld [vmem:[#allocation6] ss:$0 sm:$0xff]  ;;  %v286_v12 = vld [vmem:[%s1574_s19 + $0x8] sm:$0xff] }
  0x5b   : > { %242 = vst [vmem:[#allocation2] sm:$0xff] %v1386_v0  ;;  %243 = vst [vmem:[#allocation2 + $0x8] sm:$0xff] %v1386_v0  ;;  %v1586_v2 = vld [vmem:[#allocation6 + $0x1] ss:$0 sm:$0xff]  ;;  %v1588_v3 = vld [vmem:[#allocation6 + $0x2] ss:$0 sm:$0xff] }
  0x5c   : > { %244 = vst [vmem:[#allocation2 + $0x10] sm:$0x3] %v1386_v0  ;;  %246 = vst [vmem:[#allocation2 + $0x198] sm:$0xff] %v1386_v0  ;;  %v1590_v4 = vld [vmem:[#allocation6 + $0x3] ss:$0 sm:$0xff]  ;;  %v287_v13 = vld [vmem:[%s1574_s19 + $0x10] sm:$0xff] }
  0x5d   : > { %247 = vst [vmem:[#allocation2 + $0x1a0] sm:$0xff] %v1386_v0  ;;  %248 = vst [vmem:[#allocation2 + $0x1a8] sm:$0x3] %v1386_v0  ;;  %v1592_v5 = vld [vmem:[#allocation6 + $0x4] ss:$0 sm:$0xff]  ;;  %v288_v14 = vld [vmem:[%s1574_s19 + $0x18] sm:$0xff] }
  0x5e   : > { %250 = vst [vmem:[#allocation2 + $0x18] sm:$0x1] %v1386_v0  ;;  %251 = vst [vmem:[#allocation2 + $0x30] sm:$0x1] %v1386_v0  ;;  %v1594_v6 = vld [vmem:[#allocation6 + $0x5] ss:$0 sm:$0xff] }
  0x5f   : > { %252 = vst [vmem:[#allocation2 + $0x48] sm:$0x1] %v1386_v0  ;;  %253 = vst [vmem:[#allocation2 + $0x60] sm:$0x1] %v1386_v0  ;;  %v1596_v7 = vld [vmem:[#allocation6 + $0x6] ss:$0 sm:$0xff] }
  0x60   : > { %254 = vst [vmem:[#allocation2 + $0x78] sm:$0x1] %v1386_v0  ;;  %255 = vst [vmem:[#allocation2 + $0x90] sm:$0x1] %v1386_v0  ;;  %v1598_v8 = vld [vmem:[#allocation6 + $0x7] ss:$0 sm:$0xff] }
  0x61   : > { %256 = vst [vmem:[#allocation2 + $0xa8] sm:$0x1] %v1386_v0  ;;  %257 = vst [vmem:[#allocation2 + $0xc0] sm:$0x1] %v1386_v0  ;;  %v1600_v9 = vld [vmem:[#allocation6 + $0x8] ss:$0 sm:$0xff] }
  0x62   : > { %258 = vst [vmem:[#allocation2 + $0xd8] sm:$0x1] %v1386_v0  ;;  %259 = vst [vmem:[#allocation2 + $0xf0] sm:$0x1] %v1386_v0  ;;  %v1605_v10 = vld [vmem:[%s1975_s2] ss:$0 sm:$0xff] }
  0x63   : > { %260 = vst [vmem:[#allocation2 + $0x108] sm:$0x1] %v1386_v0  ;;  %261 = vst [vmem:[#allocation2 + $0x120] sm:$0x1] %v1386_v0  ;;  %v285_v11 = vld [vmem:[%s1574_s19] sm:$0xff]  ;;  %v290_v16 = vld [vmem:[%s1574_s19 + $0x28] sm:$0xff] }
  0x64   : > { %262 = vst [vmem:[#allocation2 + $0x138] sm:$0x1] %v1386_v0  ;;  %263 = vst [vmem:[#allocation2 + $0x150] sm:$0x1] %v1386_v0  ;;  %v289_v15 = vld [vmem:[%s1574_s19 + $0x20] sm:$0xff]  ;;  %v291_v17 = vld [vmem:[%s1574_s19 + $0x30] sm:$0xff] }
  0x65   : > { %264 = vst [vmem:[#allocation2 + $0x168] sm:$0x1] %v1386_v0  ;;  %265 = vst [vmem:[#allocation2 + $0x180] sm:$0x1] %v1386_v0  ;;  %v292_v18 = vld [vmem:[%s1574_s19 + $0x38] sm:$0xff]  ;;  %v293_v19 = vld [vmem:[%s1574_s19 + $0x40] sm:$0xff] }
  0x66   : > { %268 = vst [vmem:[#allocation2 + $0x29] sm:$0x1] %v1386_v0  ;;  %269 = vst [vmem:[#allocation2 + $0x41] sm:$0x1] %v1386_v0  ;;  %v294_v20 = vld [vmem:[%s1574_s19 + $0x48] sm:$0xff]  ;;  %v295_v21 = vld [vmem:[%s1574_s19 + $0x50] sm:$0xff] }
  0x67   : > { %270 = vst [vmem:[#allocation2 + $0x59] sm:$0x1] %v1386_v0  ;;  %271 = vst [vmem:[#allocation2 + $0x71] sm:$0x1] %v1386_v0  ;;  %v296_v22 = vld [vmem:[%s1574_s19 + $0x58] sm:$0xff]  ;;  %v297_v23 = vld [vmem:[%s1574_s19 + $0x60] sm:$0xff] }
  0x68   : > { %272 = vst [vmem:[#allocation2 + $0x89] sm:$0x1] %v1386_v0  ;;  %273 = vst [vmem:[#allocation2 + $0xa1] sm:$0x1] %v1386_v0  ;;  %v298_v24 = vld [vmem:[%s1574_s19 + $0x68] sm:$0xff]  ;;  %v299_v25 = vld [vmem:[%s1574_s19 + $0x70] sm:$0xff] }
  0x69   : > { %274 = vst [vmem:[#allocation2 + $0xb9] sm:$0x1] %v1386_v0  ;;  %275 = vst [vmem:[#allocation2 + $0xd1] sm:$0x1] %v1386_v0  ;;  %v300_v26 = vld [vmem:[%s1574_s19 + $0x78] sm:$0xff]  ;;  %v301_v27 = vld [vmem:[%s1574_s19 + $0x80] sm:$0xff] }
  0x6a   : > { %276 = vst [vmem:[#allocation2 + $0xe9] sm:$0x1] %v1386_v0  ;;  %277 = vst [vmem:[#allocation2 + $0x101] sm:$0x1] %v1386_v0  ;;  %v302_v28 = vld [vmem:[%s1574_s19 + $0x88] sm:$0xff]  ;;  %v303_v29 = vld [vmem:[%s1574_s19 + $0x90] sm:$0xff] }
  0x6b   : > { %278 = vst [vmem:[#allocation2 + $0x119] sm:$0x1] %v1386_v0  ;;  %279 = vst [vmem:[#allocation2 + $0x131] sm:$0x1] %v1386_v0  ;;  %v304_v30 = vld [vmem:[%s1574_s19 + $0x98] sm:$0xff]  ;;  %v305_v31 = vld [vmem:[%s1574_s19 + $0xa0] sm:$0xff] }
  0x6c   : > { %280 = vst [vmem:[#allocation2 + $0x149] sm:$0x1] %v1386_v0  ;;  %281 = vst [vmem:[#allocation2 + $0x161] sm:$0x1] %v1386_v0  ;;  %v306_v32 = vld [vmem:[%s1574_s19 + $0xa8] sm:$0xff]  ;;  %v307_v33 = vld [vmem:[%s1574_s19 + $0xb0] sm:$0xff] }
  0x6d   : > { %282 = vst [vmem:[#allocation2 + $0x179] sm:$0x1] %v1386_v0  ;;  %283 = vst [vmem:[#allocation2 + $0x191] sm:$0x1] %v1386_v0  ;;  %v308_v34 = vld [vmem:[%s1574_s19 + $0xb8] sm:$0xff]  ;;  %v309_v35 = vld [vmem:[%s1574_s19 + $0xc0] sm:$0xff] }
  0x6e   : > { %249 = vst [vmem:[#allocation2] sm:$0x1] %v1386_v0  ;;  %266 = vst [vmem:[#allocation2 + $0x198] sm:$0x1] %v1386_v0  ;;  %v310_v36 = vld [vmem:[%s1574_s19 + $0xc8] sm:$0xff]  ;;  %v311_v37 = vld [vmem:[%s1574_s19 + $0xd0] sm:$0xff] }
  0x6f   : > { %267 = vst [vmem:[#allocation2 + $0x11] sm:$0x1] %v1386_v0  ;;  %284 = vst [vmem:[#allocation2 + $0x1a9] sm:$0x1] %v1386_v0  ;;  %v312_v38 = vld [vmem:[%s1574_s19 + $0xd8] sm:$0xff]  ;;  %v313_v39 = vld [vmem:[%s1574_s19 + $0xe0] sm:$0xff] }
  0x70   : > { %318 = vst [vmem:[#allocation2 + $0x19] sm:$0xff] %v285_v11  ;;  %319 = vst [vmem:[#allocation2 + $0x21] sm:$0xff] %v286_v12  ;;  %v314_v40 = vld [vmem:[%s1574_s19 + $0xe8] sm:$0xff]  ;;  %v315_v41 = vld [vmem:[%s1574_s19 + $0xf0] sm:$0xff]  ;;  %s1641_s24 = scalar_lea.vmem [#allocation8], %s1018_s29  ;;  %s1643_s10 = smov 0  }
  0x71   : > { %320 = vst [vmem:[#allocation2 + $0x31] sm:$0xff] %v287_v13  ;;  %321 = vst [vmem:[#allocation2 + $0x39] sm:$0xff] %v288_v14  ;;  %v316_v42 = vld [vmem:[%s1574_s19 + $0xf8] sm:$0xff] }
  0x72   : > { %322 = vst [vmem:[#allocation2 + $0x49] sm:$0xff] %v289_v15  ;;  %323 = vst [vmem:[#allocation2 + $0x51] sm:$0xff] %v290_v16 }
  0x73   : > { %324 = vst [vmem:[#allocation2 + $0x61] sm:$0xff] %v291_v17  ;;  %325 = vst [vmem:[#allocation2 + $0x69] sm:$0xff] %v292_v18 }
  0x74   : > { %326 = vst [vmem:[#allocation2 + $0x79] sm:$0xff] %v293_v19  ;;  %327 = vst [vmem:[#allocation2 + $0x81] sm:$0xff] %v294_v20 }
  0x75   : > { %328 = vst [vmem:[#allocation2 + $0x91] sm:$0xff] %v295_v21  ;;  %329 = vst [vmem:[#allocation2 + $0x99] sm:$0xff] %v296_v22 }
  0x76   : > { %330 = vst [vmem:[#allocation2 + $0xa9] sm:$0xff] %v297_v23  ;;  %331 = vst [vmem:[#allocation2 + $0xb1] sm:$0xff] %v298_v24 }
  0x77   : > { %332 = vst [vmem:[#allocation2 + $0xc1] sm:$0xff] %v299_v25  ;;  %333 = vst [vmem:[#allocation2 + $0xc9] sm:$0xff] %v300_v26 }
  0x78   : > { %334 = vst [vmem:[#allocation2 + $0xd9] sm:$0xff] %v301_v27  ;;  %335 = vst [vmem:[#allocation2 + $0xe1] sm:$0xff] %v302_v28 }
  0x79   : > { %336 = vst [vmem:[#allocation2 + $0xf1] sm:$0xff] %v303_v29  ;;  %337 = vst [vmem:[#allocation2 + $0xf9] sm:$0xff] %v304_v30 }
  0x7a   : > { %338 = vst [vmem:[#allocation2 + $0x109] sm:$0xff] %v305_v31  ;;  %339 = vst [vmem:[#allocation2 + $0x111] sm:$0xff] %v306_v32 }
  0x7b   : > { %340 = vst [vmem:[#allocation2 + $0x121] sm:$0xff] %v307_v33  ;;  %341 = vst [vmem:[#allocation2 + $0x129] sm:$0xff] %v308_v34 }
  0x7c   : > { %342 = vst [vmem:[#allocation2 + $0x139] sm:$0xff] %v309_v35  ;;  %343 = vst [vmem:[#allocation2 + $0x141] sm:$0xff] %v310_v36 }
  0x7d   : > { %344 = vst [vmem:[#allocation2 + $0x151] sm:$0xff] %v311_v37  ;;  %345 = vst [vmem:[#allocation2 + $0x159] sm:$0xff] %v312_v38 }
  0x7e   : > { %346 = vst [vmem:[#allocation2 + $0x169] sm:$0xff] %v313_v39  ;;  %347 = vst [vmem:[#allocation2 + $0x171] sm:$0xff] %v314_v40 }
  0x7f   : > { %348 = vst [vmem:[#allocation2 + $0x181] sm:$0xff] %v315_v41  ;;  %349 = vst [vmem:[#allocation2 + $0x189] sm:$0xff] %v316_v42 }
  0x80 LB: >> { %s1022_s11 = smul.u32 192, %s1380_s10  ;;  %s1140_s18 = sshll.u32 %s1380_s10, 7  ;;  %s1380_s10 = sphi %s1643_s10, %s365_s10  }
  0x81   : >> { %s1731_s25 = scalar_lea.vmem %s1641_s24, %s1140_s18 [#allocation8]  ;;  %s365_s10 = sadd.s32 1, %s1380_s10  }
  0x82   : >> { %s1649_s9 = scalar_lea.vmem [#allocation2], %s1022_s11  ;;  %p362_p4 = scmp.ge.s32.totalorder %s365_s10, 2  }
  0x83   : > { %s1141_s8 = sshll.u32 (%p362_p4), %s1368_s15, 12  ;;  %s882_s6 = sshll.u32 (%p362_p4), %s1641_s24, 4  ;;  %s1924_s6 = int_to_ptr.vmem [resolvable:$true] %s882_s6 }
  0x84   : > { %s1921_s4 = scalar_lea.hbm (%p362_p4), %s1976_s3, %s1141_s8  ;;  %s868_s29 = scalar_lea.sflag (%p362_p4), [#allocation5], %s1568_s30 }
  0x85   : > { %s1286_s7 = scalar_lea.vmem (%p362_p4), %s1924_s6, 4096  ;;  %s1387_s19 = smov (%p362_p4), [#allocation8]  }
  0x86   : >> { %v369_v43 = vld [vmem:[%s1649_s9] sm:$0xff]  ;;  %v1029_v48 = vld [vmem:[%s1649_s9 + $0x18] sm:$0xff]  ;;  %v370_v53 = vld [vmem:[%s1649_s9 + $0x8] sm:$0xff]  ;;  %p1287_p6 = scmp.ne.s32.totalorder (%p362_p4), %s1924_s6, %s1286_s7  ;;  %s1290_s20 = sshll.u32 (%p362_p4), %s1387_s19, 4  ;;  %s1291_s20 = int_to_ptr.vmem [resolvable:$false] %s1290_s20 }
  0x87   : >> { %v427_v44 = vld [vmem:[%s1649_s9 + $0x1] sm:$0xff]  ;;  %v389_v46 = vmul.f32 %v1584_v1, %v369_v43  ;;  %v1046_v49 = vld [vmem:[%s1649_s9 + $0x19] sm:$0xff]  ;;  %v391_v50 = vmul.f32 %v1029_v48, %v1584_v1  ;;  %v428_v54 = vld [vmem:[%s1649_s9 + $0x9] sm:$0xff]  ;;  %v554_v56 = vmul.f32 %v1590_v4, %v1029_v48  ;;  %v390_v60 = vmul.f32 %v1584_v1, %v370_v53  ;;  %s1292_s15 = scalar_lea.vmem (%p362_p4), %s1291_s20, 8192  ;;  %p1293_p11 = scmp.lt.s32.totalorder (%p362_p4), %s1924_s6, %s1291_s20 }
  0x88   : >> { %v479_v45 = vld [vmem:[%s1649_s9 + $0x2] sm:$0xff]  ;;  %v447_v47 = vmul.f32 %v1586_v2, %v427_v44  ;;  %v480_v55 = vld [vmem:[%s1649_s9 + $0xa] sm:$0xff]  ;;  %v606_v57 = vmul.f32 %v1592_v5, %v1046_v49  ;;  %v1063_v58 = vld [vmem:[%s1649_s9 + $0x1a] sm:$0xff]  ;;  %v448_v61 = vmul.f32 %v1586_v2, %v428_v54  ;;  %v449_v24 = vmul.f32 %v1046_v49, %v1586_v2  ;;  %p1288_p8 = pnand (%p362_p4), %p1287_p6, %p1509_p10  ;;  %p1294_p0 = scmp.lt.s32.totalorder (%p362_p4), %s1292_s15, %s1286_s7 }
  0x89   : >> { %v411_v51 = vadd.f32 %v1605_v10, %v389_v46  ;;  %v499_v52 = vmul.f32 %v1588_v3, %v479_v45  ;;  %v1082_v59 = vld [vmem:[%s1649_s9 + $0x30] sm:$0xff]  ;;  %v658_v63 = vmul.f32 %v1594_v6, %v1063_v58  ;;  %v413_v13 = vadd.f32 %v1605_v10, %v391_v50  ;;  %v1030_v18 = vld [vmem:[%s1649_s9 + $0x20] sm:$0xff]  ;;  %v1083_v23 = vld [vmem:[%s1649_s9 + $0x38] sm:$0xff] }
  0x8a   : >> { %v713_v0 = vmul.f32 %v1596_v7, %v1082_v59  ;;  %v1099_v11 = vld [vmem:[%s1649_s9 + $0x31] sm:$0xff]  ;;  %v412_v16 = vadd.f32 %v1605_v10, %v390_v60  ;;  %v500_v17 = vmul.f32 %v1588_v3, %v480_v55  ;;  %v555_v20 = vmul.f32 %v1590_v4, %v1030_v18  ;;  %v1047_v21 = vld [vmem:[%s1649_s9 + $0x21] sm:$0xff]  ;;  %v1100_v30 = vld [vmem:[%s1649_s9 + $0x39] sm:$0xff]  ;;  %p1289_p12 = pneg (%p362_p4), %p1288_p8  ;;  %p1295_p5 = por (%p362_p4), %p1294_p0, %p1293_p11 }
  0x8b   : >> { %v463_v62 = vadd.f32 %v447_v47, %v411_v51  ;;  %v1116_v12 = vld [vmem:[%s1649_s9 + $0x32] sm:$0xff]  ;;  %v765_v14 = vmul.f32 %v1598_v8, %v1099_v11  ;;  %v1064_v22 = vld [vmem:[%s1649_s9 + $0x22] sm:$0xff]  ;;  %v501_v25 = vmul.f32 %v1063_v58, %v1588_v3  ;;  %v607_v27 = vmul.f32 %v1592_v5, %v1047_v21  ;;  %v1117_v33 = vld [vmem:[%s1649_s9 + $0x3a] sm:$0xff] }
  0x8c   : >> { %v1677_v15 = vmul.f32 %v1600_v9, %v1116_v12  ;;  %v464_v26 = vadd.f32 %v448_v61, %v412_v16  ;;  %v659_v28 = vmul.f32 %v1594_v6, %v1064_v22  ;;  %v714_v29 = vmul.f32 %v1596_v7, %v1083_v23  ;;  %v1701_v44 = vld [vmem:[%s1649_s9 + $0x48] sm:$0xff]  ;;  %p1296_p9 = pnand (%p362_p4), %p1295_p5, %p1289_p12 }
  0x8d   : >> { %v515_v19 = vadd.f32 %v499_v52, %v463_v62  ;;  %v766_v32 = vmul.f32 %v1598_v8, %v1100_v30  ;;  %v465_v34 = vadd.f32 %v449_v24, %v413_v13  ;;  %v556_v35 = vmul.f32 %v1082_v59, %v1590_v4  ;;  %v1706_v47 = vld [vmem:[%s1649_s9 + $0x49] sm:$0xff] }
  0x8e   : >> { %v516_v36 = vadd.f32 %v500_v17, %v464_v26  ;;  %v818_v37 = vmul.f32 %v1600_v9, %v1117_v33  ;;  %v392_v38 = vmul.f32 %v1030_v18, %v1584_v1  ;;  %v450_v39 = vmul.f32 %v1047_v21, %v1586_v2  ;;  %v1714_v55 = vld [vmem:[%s1649_s9 + $0x4a] sm:$0xff] }
  0x8f   : >> { %v570_v31 = vadd.f32 %v554_v56, %v515_v19  ;;  %v517_v41 = vadd.f32 %v501_v25, %v465_v34  ;;  %v608_v42 = vmul.f32 %v1099_v11, %v1592_v5  ;;  %v660_v43 = vmul.f32 %v1116_v12, %v1594_v6  ;;  %v1723_v17 = vld [vmem:[%s1649_s9 + $0x50] sm:$0xff] }
  0x90   : >> { %v571_v45 = vadd.f32 %v555_v20, %v516_v36  ;;  %v715_v46 = vmul.f32 %v1596_v7, %v1701_v44  ;;  %v414_v48 = vadd.f32 %v1605_v10, %v392_v38  ;;  %v502_v49 = vmul.f32 %v1064_v22, %v1588_v3  ;;  %v1102_v34 = vld [vmem:[%s1649_s9 + $0x51] sm:$0xff] }
  0x91   : >> { %v622_v40 = vadd.f32 %v606_v57, %v570_v31  ;;  %v572_v51 = vadd.f32 %v556_v35, %v517_v41  ;;  %v767_v52 = vmul.f32 %v1598_v8, %v1706_v47  ;;  %v557_v53 = vmul.f32 %v1083_v23, %v1590_v4 }
  0x92   : >> { %v623_v54 = vadd.f32 %v607_v27, %v571_v45  ;;  %v466_v56 = vadd.f32 %v450_v39, %v414_v48  ;;  %v393_v57 = vmul.f32 %v1082_v59, %v1584_v1  ;;  %v451_v58 = vmul.f32 %v1099_v11, %v1586_v2 }
  0x93   : >> { %v674_v50 = vadd.f32 %v658_v63, %v622_v40  ;;  %v624_v61 = vadd.f32 %v608_v42, %v572_v51  ;;  %v819_v62 = vmul.f32 %v1600_v9, %v1714_v55  ;;  %v609_v63 = vmul.f32 %v1100_v30, %v1592_v5  ;;  %v1120_v51 = vld [vmem:[%s1649_s9 + $0x62] sm:$0xff] }
  0x94   : >> { %v675_v13 = vadd.f32 %v659_v28, %v623_v54  ;;  %v518_v16 = vadd.f32 %v502_v49, %v466_v56  ;;  %v415_v18 = vadd.f32 %v1605_v10, %v393_v57  ;;  %v503_v19 = vmul.f32 %v1116_v12, %v1588_v3 }
  0x95   : >> { %v729_v60 = vadd.f32 %v713_v0, %v674_v50  ;;  %v676_v20 = vadd.f32 %v660_v43, %v624_v61  ;;  %v661_v0 = vmul.f32 %v1117_v33, %v1594_v6  ;;  %v716_v11 = vmul.f32 %v1596_v7, %v1723_v17  ;;  %v1119_v43 = vld [vmem:[%s1649_s9 + $0x52] sm:$0xff]  ;;  %v1103_v50 = vld [vmem:[%s1649_s9 + $0x61] sm:$0xff] }
  0x96   : >> { %v730_v21 = vadd.f32 %v714_v29, %v675_v13  ;;  %v573_v22 = vadd.f32 %v557_v53, %v518_v16  ;;  %v467_v24 = vadd.f32 %v451_v58, %v415_v18  ;;  %v558_v25 = vmul.f32 %v1701_v44, %v1590_v4  ;;  %v1087_v13 = vld [vmem:[%s1649_s9 + $0x68] sm:$0xff] }
  0x97   : >> { %v781_v59 = vadd.f32 %v765_v14, %v729_v60  ;;  %v731_v12 = vadd.f32 %v715_v46, %v676_v20  ;;  %v610_v14 = vmul.f32 %v1706_v47, %v1592_v5  ;;  %v394_v27 = vmul.f32 %v1083_v23, %v1584_v1 }
  0x98   : >> { %v782_v28 = vadd.f32 %v766_v32, %v730_v21  ;;  %v625_v31 = vadd.f32 %v609_v63, %v573_v22  ;;  %v519_v35 = vadd.f32 %v503_v19, %v467_v24  ;;  %v452_v29 = vmul.f32 %v1100_v30, %v1586_v2  ;;  %v1086_v30 = vld [vmem:[%s1649_s9 + $0x60] sm:$0xff] }
  0x99   : >> { %v833_v26 = vadd.f32 %v1677_v15, %v781_v59  ;;  %v783_v36 = vadd.f32 %v767_v52, %v731_v12  ;;  %v768_v38 = vmul.f32 %v1598_v8, %v1102_v34  ;;  %v416_v15 = vadd.f32 %v1605_v10, %v394_v27 }
  0x9a   : >> { %v504_v39 = vmul.f32 %v1117_v33, %v1588_v3  ;;  %v834_v23 = vadd.f32 %v818_v37, %v782_v28  ;;  %v677_v32 = vadd.f32 %v661_v0, %v625_v31  ;;  %v574_v40 = vadd.f32 %v558_v25, %v519_v35  ;;  %v1104_v0 = vld [vmem:[%s1649_s9 + $0x69] sm:$0xff]  ;;  %v1088_v28 = vld [vmem:[%s1649_s9 + $0x78] sm:$0xff] }
  0x9b   : >> { %851 = vst [vmem:[%s1731_s25] sm:$0xff] %v833_v26  ;;  %v662_v41 = vmul.f32 %v1714_v55, %v1594_v6  ;;  %v835_v42 = vadd.f32 %v819_v62, %v783_v36  ;;  %v468_v45 = vadd.f32 %v452_v29, %v416_v15  ;;  %v559_v46 = vmul.f32 %v1723_v17, %v1590_v4 }
  0x9c   : >> { %852 = vst [vmem:[%s1731_s25 + $0x8] sm:$0xff] %v834_v23  ;;  %v732_v48 = vadd.f32 %v716_v11, %v677_v32  ;;  %v820_v49 = vmul.f32 %v1600_v9, %v1119_v43  ;;  %v626_v33 = vadd.f32 %v610_v14, %v574_v40  ;;  %v717_v37 = vmul.f32 %v1596_v7, %v1086_v30  ;;  %v1121_v11 = vld [vmem:[%s1649_s9 + $0x6a] sm:$0xff] }
  0x9d   : >> { %853 = vst [vmem:[%s1731_s25 + $0x10] sm:$0xff] %v835_v42  ;;  %v520_v52 = vadd.f32 %v504_v39, %v468_v45  ;;  %v611_v53 = vmul.f32 %v1102_v34, %v1592_v5  ;;  %v395_v54 = vmul.f32 %v1701_v44, %v1584_v1  ;;  %v453_v56 = vmul.f32 %v1706_v47, %v1586_v2  ;;  %v1105_v39 = vld [vmem:[%s1649_s9 + $0x79] sm:$0xff] }
  0x9e   : >> { %v784_v57 = vadd.f32 %v768_v38, %v732_v48  ;;  %v678_v58 = vadd.f32 %v662_v41, %v626_v33  ;;  %v769_v60 = vmul.f32 %v1598_v8, %v1103_v50  ;;  %v821_v61 = vmul.f32 %v1600_v9, %v1120_v51  ;;  %v1122_v48 = vld [vmem:[%s1649_s9 + $0x7a] sm:$0xff] }
  0x9f   : >> { %v575_v62 = vadd.f32 %v559_v46, %v520_v52  ;;  %v663_v63 = vmul.f32 %v1119_v43, %v1594_v6  ;;  %v417_v16 = vadd.f32 %v1605_v10, %v395_v54  ;;  %v505_v44 = vmul.f32 %v1714_v55, %v1588_v3  ;;  %v1089_v33 = vld [vmem:[%s1649_s9 + $0x80] sm:$0xff] }
  0xa0   : >> { %v836_v18 = vadd.f32 %v820_v49, %v784_v57  ;;  %v733_v19 = vadd.f32 %v717_v37, %v678_v58  ;;  %v718_v47 = vmul.f32 %v1596_v7, %v1087_v13  ;;  %v560_v59 = vmul.f32 %v1086_v30, %v1590_v4  ;;  %v1106_v57 = vld [vmem:[%s1649_s9 + $0x81] sm:$0xff] }
  0xa1   : >> { %v627_v20 = vadd.f32 %v611_v53, %v575_v62  ;;  %v469_v21 = vadd.f32 %v453_v56, %v417_v16  ;;  %v396_v22 = vmul.f32 %v1723_v17, %v1584_v1  ;;  %v454_v24 = vmul.f32 %v1102_v34, %v1586_v2  ;;  %v1123_v58 = vld [vmem:[%s1649_s9 + $0x82] sm:$0xff] }
  0xa2   : >> { %854 = vst [vmem:[%s1731_s25 + $0x18] sm:$0xff] %v836_v18  ;;  %v785_v25 = vadd.f32 %v769_v60, %v733_v19  ;;  %v770_v55 = vmul.f32 %v1598_v8, %v1104_v0  ;;  %v822_v26 = vmul.f32 %v1600_v9, %v1121_v11  ;;  %v612_v12 = vmul.f32 %v1103_v50, %v1592_v5 }
  0xa3   : >> { %v679_v14 = vadd.f32 %v663_v63, %v627_v20  ;;  %v521_v27 = vadd.f32 %v505_v44, %v469_v21  ;;  %v418_v31 = vadd.f32 %v1605_v10, %v396_v22  ;;  %v506_v35 = vmul.f32 %v1119_v43, %v1588_v3  ;;  %v1107_v22 = vld [vmem:[%s1649_s9 + $0x91] sm:$0xff] }
  0xa4   : >> { %v837_v17 = vadd.f32 %v821_v61, %v785_v25  ;;  %v664_v34 = vmul.f32 %v1120_v51, %v1594_v6  ;;  %v719_v29 = vmul.f32 %v1596_v7, %v1088_v28  ;;  %v561_v36 = vmul.f32 %v1087_v13, %v1590_v4 }
  0xa5   : >> { %v734_v38 = vadd.f32 %v718_v47, %v679_v14  ;;  %v576_v15 = vadd.f32 %v560_v59, %v521_v27  ;;  %v470_v23 = vadd.f32 %v454_v24, %v418_v31  ;;  %v397_v32 = vmul.f32 %v1086_v30, %v1584_v1  ;;  %v1090_v59 = vld [vmem:[%s1649_s9 + $0x90] sm:$0xff] }
  0xa6   : >> { %855 = vst [vmem:[%s1731_s25 + $0x20] sm:$0xff] %v837_v17  ;;  %v771_v40 = vmul.f32 %v1598_v8, %v1105_v39  ;;  %v613_v41 = vmul.f32 %v1104_v0, %v1592_v5  ;;  %v455_v42 = vmul.f32 %v1103_v50, %v1586_v2  ;;  %v507_v43 = vmul.f32 %v1120_v51, %v1588_v3 }
  0xa7   : >> { %v786_v45 = vadd.f32 %v770_v55, %v734_v38  ;;  %v628_v46 = vadd.f32 %v612_v12, %v576_v15  ;;  %v522_v49 = vadd.f32 %v506_v35, %v470_v23  ;;  %v419_v37 = vadd.f32 %v1605_v10, %v397_v32  ;;  %v1124_v12 = vld [vmem:[%s1649_s9 + $0x92] sm:$0xff] }
  0xa8   : >> { %v823_v30 = vmul.f32 %v1600_v9, %v1122_v48  ;;  %v665_v52 = vmul.f32 %v1121_v11, %v1594_v6  ;;  %v720_v53 = vmul.f32 %v1596_v7, %v1089_v33  ;;  %v562_v54 = vmul.f32 %v1088_v28, %v1590_v4  ;;  %v1091_v15 = vld [vmem:[%s1649_s9 + $0x98] sm:$0xff] }
  0xa9   : >> { %v838_v50 = vadd.f32 %v822_v26, %v786_v45  ;;  %v680_v56 = vadd.f32 %v664_v34, %v628_v46  ;;  %v577_v51 = vadd.f32 %v561_v36, %v522_v49  ;;  %v471_v60 = vadd.f32 %v455_v42, %v419_v37 }
  0xaa   : >> { %v772_v61 = vmul.f32 %v1598_v8, %v1106_v57  ;;  %v824_v62 = vmul.f32 %v1600_v9, %v1123_v58  ;;  %v398_v63 = vmul.f32 %v1087_v13, %v1584_v1  ;;  %v456_v16 = vmul.f32 %v1104_v0, %v1586_v2 }
  0xab   : >> { %856 = vst [vmem:[%s1731_s25 + $0x28] sm:$0xff] %v838_v50  ;;  %v735_v44 = vadd.f32 %v719_v29, %v680_v56  ;;  %v629_v18 = vadd.f32 %v613_v41, %v577_v51  ;;  %v523_v19 = vadd.f32 %v507_v43, %v471_v60  ;;  %v614_v47 = vmul.f32 %v1105_v39, %v1592_v5 }
  0xac   : >> { %v666_v20 = vmul.f32 %v1122_v48, %v1594_v6  ;;  %v721_v21 = vmul.f32 %v1596_v7, %v1090_v59  ;;  %v420_v24 = vadd.f32 %v1605_v10, %v398_v63  ;;  %v508_v25 = vmul.f32 %v1121_v11, %v1588_v3 }
  0xad   : >> { %v787_v13 = vadd.f32 %v771_v40, %v735_v44  ;;  %v681_v0 = vadd.f32 %v665_v52, %v629_v18  ;;  %v578_v55 = vadd.f32 %v562_v54, %v523_v19  ;;  %v773_v26 = vmul.f32 %v1598_v8, %v1107_v22  ;;  %v1125_v54 = vld [vmem:[%s1649_s9 + $0x9a] sm:$0xff] }
  0xae   : >> { %v472_v14 = vadd.f32 %v456_v16, %v420_v24  ;;  %v563_v27 = vmul.f32 %v1089_v33, %v1590_v4  ;;  %v399_v31 = vmul.f32 %v1088_v28, %v1584_v1  ;;  %v457_v35 = vmul.f32 %v1105_v39, %v1586_v2  ;;  %v1092_v16 = vld [vmem:[%s1649_s9 + $0xa8] sm:$0xff] }
  0xaf   : >> { %v839_v17 = vadd.f32 %v823_v30, %v787_v13  ;;  %v736_v34 = vadd.f32 %v720_v53, %v681_v0  ;;  %v630_v29 = vadd.f32 %v614_v47, %v578_v55  ;;  %v825_v11 = vmul.f32 %v1600_v9, %v1124_v12  ;;  %v1108_v53 = vld [vmem:[%s1649_s9 + $0x99] sm:$0xff]  ;;  %v1126_v13 = vld [vmem:[%s1649_s9 + $0xaa] sm:$0xff] }
  0xb0   : >> { %v524_v36 = vadd.f32 %v508_v25, %v472_v14  ;;  %v615_v38 = vmul.f32 %v1106_v57, %v1592_v5  ;;  %v421_v23 = vadd.f32 %v1605_v10, %v399_v31  ;;  %v509_v32 = vmul.f32 %v1122_v48, %v1588_v3  ;;  %v1109_v25 = vld [vmem:[%s1649_s9 + $0xa9] sm:$0xff] }
  0xb1   : >> { %857 = vst [vmem:[%s1731_s25 + $0x30] sm:$0xff] %v839_v17  ;;  %v788_v40 = vadd.f32 %v772_v61, %v736_v34  ;;  %v682_v28 = vadd.f32 %v666_v20, %v630_v29  ;;  %v667_v39 = vmul.f32 %v1123_v58, %v1594_v6  ;;  %v722_v41 = vmul.f32 %v1596_v7, %v1091_v15  ;;  %v1093_v34 = vld [vmem:[%s1649_s9 + $0xb0] sm:$0xff] }
  0xb2   : >> { %v579_v42 = vadd.f32 %v563_v27, %v524_v36  ;;  %v473_v43 = vadd.f32 %v457_v35, %v421_v23  ;;  %v564_v45 = vmul.f32 %v1090_v59, %v1590_v4  ;;  %v400_v46 = vmul.f32 %v1089_v33, %v1584_v1 }
  0xb3   : >> { %v840_v49 = vadd.f32 %v824_v62, %v788_v40  ;;  %v737_v37 = vadd.f32 %v721_v21, %v682_v28  ;;  %v616_v48 = vmul.f32 %v1107_v22, %v1592_v5  ;;  %v458_v30 = vmul.f32 %v1106_v57, %v1586_v2  ;;  %v1110_v28 = vld [vmem:[%s1649_s9 + $0xb1] sm:$0xff] }
  0xb4   : >> { %v631_v52 = vadd.f32 %v615_v38, %v579_v42  ;;  %v525_v50 = vadd.f32 %v509_v32, %v473_v43  ;;  %v422_v56 = vadd.f32 %v1605_v10, %v400_v46  ;;  %v510_v51 = vmul.f32 %v1123_v58, %v1588_v3 }
  0xb5   : >> { %858 = vst [vmem:[%s1731_s25 + $0x38] sm:$0xff] %v840_v49  ;;  %v789_v60 = vadd.f32 %v773_v26, %v737_v37  ;;  %v774_v33 = vmul.f32 %v1598_v8, %v1108_v53  ;;  %v826_v61 = vmul.f32 %v1600_v9, %v1125_v54  ;;  %v668_v62 = vmul.f32 %v1124_v12, %v1594_v6 }
  0xb6   : >> { %v683_v57 = vadd.f32 %v667_v39, %v631_v52  ;;  %v580_v63 = vadd.f32 %v564_v45, %v525_v50  ;;  %v474_v44 = vadd.f32 %v458_v30, %v422_v56  ;;  %v565_v18 = vmul.f32 %v1091_v15, %v1590_v4  ;;  %v1127_v39 = vld [vmem:[%s1649_s9 + $0xb2] sm:$0xff]  ;;  %v1094_v52 = vld [vmem:[%s1649_s9 + $0xc0] sm:$0xff] }
  0xb7   : >> { %v841_v19 = vadd.f32 %v825_v11, %v789_v60  ;;  %v723_v58 = vmul.f32 %v1596_v7, %v1092_v16  ;;  %v401_v47 = vmul.f32 %v1090_v59, %v1584_v1  ;;  %v459_v20 = vmul.f32 %v1107_v22, %v1586_v2 }
  0xb8   : >> { %v738_v21 = vadd.f32 %v722_v41, %v683_v57  ;;  %v632_v24 = vadd.f32 %v616_v48, %v580_v63  ;;  %v526_v0 = vadd.f32 %v510_v51, %v474_v44  ;;  %v617_v55 = vmul.f32 %v1108_v53, %v1592_v5 }
  0xb9   : >> { %859 = vst [vmem:[%s1731_s25 + $0x40] sm:$0xff] %v841_v19  ;;  %v775_v26 = vmul.f32 %v1598_v8, %v1109_v25  ;;  %v827_v14 = vmul.f32 %v1600_v9, %v1126_v13  ;;  %v423_v27 = vadd.f32 %v1605_v10, %v401_v47  ;;  %v511_v59 = vmul.f32 %v1124_v12, %v1588_v3  ;;  %v1128_v19 = vld [vmem:[%s1649_s9 + $0xc2] sm:$0xff] }
  0xba   : >> { %v790_v22 = vadd.f32 %v774_v33, %v738_v21  ;;  %v684_v31 = vadd.f32 %v668_v62, %v632_v24  ;;  %v581_v35 = vadd.f32 %v565_v18, %v526_v0  ;;  %v669_v17 = vmul.f32 %v1125_v54, %v1594_v6  ;;  %v1095_v0 = vld [vmem:[%s1649_s9 + $0xc8] sm:$0xff] }
  0xbb   : >> { %v724_v29 = vmul.f32 %v1596_v7, %v1093_v34  ;;  %v475_v11 = vadd.f32 %v459_v20, %v423_v27  ;;  %v566_v36 = vmul.f32 %v1092_v16, %v1590_v4  ;;  %v402_v38 = vmul.f32 %v1091_v15, %v1584_v1 }
  0xbc   : >> { %v842_v23 = vadd.f32 %v826_v61, %v790_v22  ;;  %v739_v32 = vadd.f32 %v723_v58, %v684_v31  ;;  %v633_v40 = vadd.f32 %v617_v55, %v581_v35  ;;  %v460_v12 = vmul.f32 %v1108_v53, %v1586_v2  ;;  %v1111_v61 = vld [vmem:[%s1649_s9 + $0xc1] sm:$0xff]  ;;  %v1112_v22 = vld [vmem:[%s1649_s9 + $0xc9] sm:$0xff] }
  0xbd   : >> { %v527_v41 = vadd.f32 %v511_v59, %v475_v11  ;;  %v618_v42 = vmul.f32 %v1109_v25, %v1592_v5  ;;  %v424_v43 = vadd.f32 %v1605_v10, %v402_v38  ;;  %v512_v45 = vmul.f32 %v1125_v54, %v1588_v3  ;;  %v1129_v38 = vld [vmem:[%s1649_s9 + $0xca] sm:$0xff] }
  0xbe   : >> { %860 = vst [vmem:[%s1731_s25 + $0x48] sm:$0xff] %v842_v23  ;;  %v791_v46 = vadd.f32 %v775_v26, %v739_v32  ;;  %v685_v49 = vadd.f32 %v669_v17, %v633_v40  ;;  %v776_v15 = vmul.f32 %v1598_v8, %v1110_v28  ;;  %v828_v37 = vmul.f32 %v1600_v9, %v1127_v39  ;;  %v1096_v23 = vld [vmem:[%s1649_s9 + $0xd8] sm:$0xff] }
  0xbf   : >> { %v582_v48 = vadd.f32 %v566_v36, %v527_v41  ;;  %v670_v30 = vmul.f32 %v1126_v13, %v1594_v6  ;;  %v476_v53 = vadd.f32 %v460_v12, %v424_v43  ;;  %v567_v50 = vmul.f32 %v1093_v34, %v1590_v4  ;;  %v1113_v43 = vld [vmem:[%s1649_s9 + $0xd9] sm:$0xff] }
  0xc0   : >> { %v843_v56 = vadd.f32 %v827_v14, %v791_v46  ;;  %v740_v51 = vadd.f32 %v724_v29, %v685_v49  ;;  %v725_v54 = vmul.f32 %v1596_v7, %v1094_v52  ;;  %v403_v60 = vmul.f32 %v1092_v16, %v1584_v1 }
  0xc1   : >> { %v634_v33 = vadd.f32 %v618_v42, %v582_v48  ;;  %v528_v62 = vadd.f32 %v512_v45, %v476_v53  ;;  %v619_v57 = vmul.f32 %v1110_v28, %v1592_v5  ;;  %v461_v63 = vmul.f32 %v1109_v25, %v1586_v2 }
  0xc2   : >> { %861 = vst [vmem:[%s1731_s25 + $0x50] sm:$0xff] %v843_v56  ;;  %v792_v44 = vadd.f32 %v776_v15, %v740_v51  ;;  %v777_v18 = vmul.f32 %v1598_v8, %v1111_v61  ;;  %v425_v58 = vadd.f32 %v1605_v10, %v403_v60  ;;  %v513_v47 = vmul.f32 %v1126_v13, %v1588_v3 }
  0xc3   : >> { %v686_v16 = vadd.f32 %v670_v30, %v634_v33  ;;  %v829_v20 = vmul.f32 %v1600_v9, %v1128_v19  ;;  %v583_v21 = vadd.f32 %v567_v50, %v528_v62  ;;  %v671_v24 = vmul.f32 %v1127_v39, %v1594_v6  ;;  %v1097_v50 = vld [vmem:[%s1649_s9 + $0xe0] sm:$0xff] }
  0xc4   : >> { %v844_v25 = vadd.f32 %v828_v37, %v792_v44  ;;  %v726_v55 = vmul.f32 %v1596_v7, %v1095_v0  ;;  %v477_v26 = vadd.f32 %v461_v63, %v425_v58  ;;  %v568_v14 = vmul.f32 %v1094_v52, %v1590_v4  ;;  %v1131_v44 = vld [vmem:[%s1649_s9 + $0xe2] sm:$0xff] }
  0xc5   : >> { %v741_v27 = vadd.f32 %v725_v54, %v686_v16  ;;  %v635_v59 = vadd.f32 %v619_v57, %v583_v21  ;;  %v404_v13 = vmul.f32 %v1093_v34, %v1584_v1  ;;  %v462_v31 = vmul.f32 %v1110_v28, %v1586_v2 }
  0xc6   : >> { %862 = vst [vmem:[%s1731_s25 + $0x58] sm:$0xff] %v844_v25  ;;  %v778_v35 = vmul.f32 %v1598_v8, %v1112_v22  ;;  %v529_v17 = vadd.f32 %v513_v47, %v477_v26  ;;  %v620_v29 = vmul.f32 %v1111_v61, %v1592_v5  ;;  %v514_v40 = vmul.f32 %v1127_v39, %v1588_v3  ;;  %v1130_v39 = vld [vmem:[%s1649_s9 + $0xda] sm:$0xff] }
  0xc7   : >> { %v793_v11 = vadd.f32 %v777_v18, %v741_v27  ;;  %v687_v36 = vadd.f32 %v671_v24, %v635_v59  ;;  %v426_v32 = vadd.f32 %v1605_v10, %v404_v13  ;;  %v830_v34 = vmul.f32 %v1600_v9, %v1129_v38  ;;  %v1114_v61 = vld [vmem:[%s1649_s9 + $0xe1] sm:$0xff] }
  0xc8   : >> { %v584_v12 = vadd.f32 %v568_v14, %v529_v17  ;;  %v672_v28 = vmul.f32 %v1128_v19, %v1594_v6  ;;  %v569_v46 = vmul.f32 %v1095_v0, %v1590_v4  ;;  %v727_v15 = vmul.f32 %v1596_v7, %v1096_v23 }
  0xc9   : >> { %v845_v41 = vadd.f32 %v829_v20, %v793_v11  ;;  %v742_v42 = vadd.f32 %v726_v55, %v687_v36  ;;  %v478_v45 = vadd.f32 %v462_v31, %v426_v32  ;;  %v621_v30 = vmul.f32 %v1112_v22, %v1592_v5 }
  0xca   : >> { %v636_v49 = vadd.f32 %v620_v29, %v584_v12  ;;  %v779_v53 = vmul.f32 %v1598_v8, %v1113_v43  ;;  %v673_v54 = vmul.f32 %v1129_v38, %v1594_v6  ;;  %v831_v33 = vmul.f32 %v1600_v9, %v1130_v39 }
  0xcb   : >> { %863 = vst [vmem:[%s1731_s25 + $0x60] sm:$0xff] %v845_v41  ;;  %v794_v37 = vadd.f32 %v778_v35, %v742_v42  ;;  %v530_v48 = vadd.f32 %v514_v40, %v478_v45  ;;  %v728_v57 = vmul.f32 %v1596_v7, %v1097_v50  ;;  %v780_v19 = vmul.f32 %v1598_v8, %v1114_v61 }
  0xcc   : >> { %v688_v52 = vadd.f32 %v672_v28, %v636_v49  ;;  %v832_v16 = vmul.f32 %v1600_v9, %v1131_v44 }
  0xcd   : >> { %v846_v56 = vadd.f32 %v830_v34, %v794_v37  ;;  %v585_v51 = vadd.f32 %v569_v46, %v530_v48 }
  0xce   : >> { %v743_v60 = vadd.f32 %v727_v15, %v688_v52 }
  0xcf   : >> { %864 = vst [vmem:[%s1731_s25 + $0x68] sm:$0xff] %v846_v56  ;;  %v637_v62 = vadd.f32 %v621_v30, %v585_v51 }
  0xd0   : >> { %v795_v63 = vadd.f32 %v779_v53, %v743_v60 }
  0xd1   : >> { %v689_v18 = vadd.f32 %v673_v54, %v637_v62 }
  0xd2   : >> { %v847_v58 = vadd.f32 %v831_v33, %v795_v63 }
  0xd3   : >> { %v744_v47 = vadd.f32 %v728_v57, %v689_v18  ;;  %364 = sbr.rel (!%p362_p4) target bundleno = 128 (0x80), region = 98 }
  0xd4   : >> { %865 = vst [vmem:[%s1731_s25 + $0x70] sm:$0xff] %v847_v58 }
  0xd5   : >> { %v796_v20 = vadd.f32 %v780_v19, %v744_v47 }
  0xd7   : >> { %v848_v21 = vadd.f32 %v832_v16, %v796_v20 }
  0xd9   : >> { %866 = vst [vmem:[%s1731_s25 + $0x78] sm:$0xff] %v848_v21 }
  0xda   : > { %1299 = shalt.err (!%p1296_p9)
}
  0xdb   : > { %s1300_s22 = scalar_lea.hbm %s1921_s4, 4096  ;;  %s1304_s11 = scalar_lea.hbm %s1976_s3, 8192 }
  0xdc   : > { %p1301_p1 = scmp.ne.s32.totalorder %s1921_s4, %s1300_s22  ;;  %p1305_p7 = scmp.lt.u32.totalorder %s1921_s4, %s1976_s3 }
  0xdd   : > { %p1306_p13 = scmp.lt.u32.totalorder %s1304_s11, %s1300_s22  ;;  %p1308_p6 = scmp.lt.u32.totalorder %s1300_s22, %s1921_s4 }
  0xde   : > { %p1302_p2 = pnand %p1301_p1, %p1509_p10 }
  0xdf   : > { %p1307_p4 = por %p1306_p13, %p1305_p7 }
  0xe0   : > { %p1303_p3 = pneg %p1302_p2 }
  0xe1   : > { %p1309_p8 = por %p1308_p6, %p1307_p4 }
  0xe3   : > { %p1310_p12 = pnand %p1309_p8, %p1303_p3 }
  0xe5   : > { %1313 = shalt.err (!%p1310_p12)
}
  0xe6   : > { %s1388_s25 = smov 128   ;;  %s1389_s8 = smov 8  }
  0xe7   : > { %1148 = dma.vmem_to_hbm [thread:$0]  (%p1509_p10), %s1924_s6, 4096, %s1921_s4, %s868_s29, %s1388_s25, %s1388_s25, %s1389_s8  }
  0xe8 PF: > { %s897_s26 = sand.u32 1, %s1356_s12   ;;  %p1994_p11 = scmp.ne.s32.totalorder %s1984_s23, 0 }
  0xe9   : > { %p1995_p0 = scmp.ge.s32.totalorder %s1376_s17, 2  ;;  %s898_s21 = scalar_lea.sflag [#allocation5], %s897_s26 }
  0xeb   : > { %p1159_p5 = pnand %p1995_p0, %p1994_p11 }
  0xed   : > { %1351 = dma.done.wait (!%p1159_p5), %s898_s21, 4096  }
  0xee   : > { %1353 = vsyncadd (!%p1159_p5), %s898_s21, 4294963200  ;;  %s20_s17 = sadd.s32 1, %s1376_s17   ;;  %s1996_s12 = smov %s1360_s13 }
  0xef   : > { %p17_p9 = scmp.ge.s32.totalorder %s20_s17, 4   ;;  %s1997_s13 = smov %s1364_s14 }
  0xf0   : > { %s1998_s14 = smov %s1518_s5  ;;  %s1999_s15 = smov %s1372_s16 }
  0xf1   : > { %s2000_s16 = smov %s2002_s28  ;;  %19 = sbr.rel (!%p17_p9) target bundleno = 7 (0x7), region = 109 }
  0xf8   :  { %903 = vsyncpa [#allocation4], 1 }
  0xf9   :  { %905 = vsyncpa [#allocation4 + $0x1], 1 }
  0xfa   :  { %906 = vsyncpa [#allocation7], 1 }
  0xfb   :  { %907 = vsyncpa [#allocation5], 1 }
  0xfc   :  { %909 = vsyncpa [#allocation5 + $0x1], 1 }

</bundles_post_ra>
